<compile_context>
chip_gen: v7x
topology: tpu7x:2x2x1
jax: 0.10.0
libtpu: 0.0.40
codegen_flags: <defaults>
</compile_context>

<pallas_src>
import jax
import jax.numpy as jnp
from jax import lax
from jax.experimental import pallas as pl
from jax.experimental.pallas import tpu as pltpu


def _pos_embed_kernel(ids_ref, emb_ref, pe_ref, out_ref, acc_ref):
    """One (seq-tile, batch-row, vocab-tile) grid step.

    ids_ref : (1, TS, 1) int32   token ids, ids along sublanes (no relayout for compare)
    emb_ref : (TV, Dp)           vocab rows [k*TV, (k+1)*TV) of the embedding table
    pe_ref  : (TS, Dp)           positional-encoding rows for this sequence tile
    out_ref : (1, TS, Dp)
    acc_ref : (TS, Dp) f32       VMEM accumulator, persists across the vocab axis
    """
    k = pl.program_id(2)
    nk = pl.num_programs(2)

    @pl.when(k == 0)
    def _init():
        acc_ref[...] = jnp.zeros_like(acc_ref)

    ids_col = ids_ref[0]                      # (TS, 1) int32
    ts = ids_col.shape[0]
    tv = emb_ref.shape[0]

    # Partial one-hot gather on the MXU: onehot (TS, TV) @ table tile (TV, Dp).
    vocab_iota = lax.broadcasted_iota(jnp.int32, (ts, tv), 1) + k * tv
    onehot = (ids_col == vocab_iota).astype(emb_ref.dtype)
    acc_ref[...] += jnp.dot(onehot, emb_ref[...],
                            preferred_element_type=jnp.float32)

    @pl.when(k == nk - 1)
    def _finalize():
        out = acc_ref[...] + pe_ref[...].astype(jnp.float32)
        out_ref[0] = out.astype(out_ref.dtype)


def _round_up(x, m):
    return ((x + m - 1) // m) * m


def _vmem_capacity_bytes():
    try:
        return int(pltpu.get_tpu_info().vmem_capacity_bytes)
    except Exception:
        return 64 << 20   # conservative default: v7x per-TensorCore VMEM


def _working_set_bytes(ts, tv, dp, emb_item, pe_item, out_item):
    """Full per-core VMEM working set, including in-kernel intermediates."""
    return (2 * tv * dp * emb_item          # double-buffered table tiles
            + 2 * ts * 4                    # double-buffered ids tiles (int32)
            + 2 * ts * dp * pe_item         # double-buffered pe tiles
            + 2 * ts * dp * out_item        # double-buffered out tiles
            + ts * dp * 4                   # f32 accumulator scratch
            + ts * tv * (emb_item + 4)      # one-hot + vocab iota intermediates
            + ts * dp * 4)                  # f32 matmul result before accumulate


def _select_tiles(S, V, dp, emb_item, pe_item, out_item, vmem_cap):
    """Pick (TS, TV): both multiples of 8, sized so the working set fits VMEM."""
    budget = int(vmem_cap * 0.60)            # leave headroom for compiler scratch
    big_vmem = vmem_cap >= (96 << 20)        # 128 MiB parts (v5e/v6e)
    tile_cap_bytes = (8 << 20) if big_vmem else (2 << 20)

    ts = max(8, min(1024, tile_cap_bytes // max(1, dp * 4)))
    ts -= ts % 8
    ts = max(8, ts)
    ts = min(ts, _round_up(S, 8))

    tv = min(_round_up(V, 8), 512)

    while _working_set_bytes(ts, tv, dp, emb_item, pe_item, out_item) > budget:
        if tv >= ts and tv > 8:
            tv = max(8, (tv // 2) - ((tv // 2) % 8))
        elif ts > 8:
            ts = max(8, (ts // 2) - ((ts // 2) % 8))
        else:
            break
    return ts, tv


def position_embedding(ids, emb_table, pe):
    """ids: (B, S) int, emb_table: (V, D), pe: (S, D) -> (B, S, D)."""
    B, S = ids.shape
    V, D = emb_table.shape
    assert pe.shape == (S, D)

    emb_item = jnp.dtype(emb_table.dtype).itemsize
    pe_item = jnp.dtype(pe.dtype).itemsize
    out_dtype = emb_table.dtype
    out_item = emb_item

    # Lane-dense blocks: pad the embedding dim to a multiple of 128 (no-op when
    # D % 128 == 0, i.e. for realistic model dims).
    dp = _round_up(D, 128)

    vmem_cap = _vmem_capacity_bytes()
    ts, tv = _select_tiles(S, V, dp, emb_item, pe_item, out_item, vmem_cap)

    sp = _round_up(S, ts)
    vp = _round_up(V, tv)
    ns, nk = sp // ts, vp // tv

    # Zero-pad parameters / ids to the tiled shapes (all no-ops for aligned dims).
    emb_p = emb_table
    if (vp, dp) != (V, D):
        emb_p = jnp.pad(emb_table, ((0, vp - V), (0, dp - D)))
    pe_p = pe
    if (sp, dp) != (S, D):
        pe_p = jnp.pad(pe, ((0, sp - S), (0, dp - D)))
    ids_p = ids.astype(jnp.int32)
    if sp != S:
        ids_p = jnp.pad(ids_p, ((0, 0), (0, sp - S)))
    # ids as a column so the one-hot compare needs no lane<->sublane relayout.
    ids3 = ids_p.reshape(B, sp, 1)

    working = _working_set_bytes(ts, tv, dp, emb_item, pe_item, out_item)
    # Generation-aware limit with real headroom: never request the whole chip.
    vmem_limit = int(min(max(int(working * 1.25), 16 << 20), int(vmem_cap * 0.80)))

    cost = pl.CostEstimate(
        flops=2 * B * sp * vp * dp,                      # one-hot gather matmul
        transcendentals=0,
        bytes_accessed=(B * sp * 4                       # ids
                        + sp * dp * pe_item              # pe (each tile fetched once)
                        + ns * B * vp * dp * emb_item    # table streamed per (si, b)
                        + B * sp * dp * out_item))       # output

    # seq-tile leads (parallel, gets megacore-sharded on v7x even for tiny B),
    # batch is parallel, vocab is the reduction axis -> last and "arbitrary".
    grid = (ns, B, nk)

    out_p = pl.pallas_call(
        _pos_embed_kernel,
        grid=grid,
        in_specs=[
            pl.BlockSpec((1, ts, 1), lambda si, b, k: (b, si, 0)),   # ids tile
            pl.BlockSpec((tv, dp), lambda si, b, k: (k, 0)),         # table tile (streamed)
            pl.BlockSpec((ts, dp), lambda si, b, k: (si, 0)),        # pe tile
        ],
        out_specs=pl.BlockSpec((1, ts, dp), lambda si, b, k: (b, si, 0)),
        out_shape=jax.ShapeDtypeStruct((B, sp, dp), out_dtype),
        scratch_shapes=[pltpu.VMEM((ts, dp), jnp.float32)],
        compiler_params=pltpu.CompilerParams(
            dimension_semantics=("parallel", "parallel", "arbitrary"),
            vmem_limit_bytes=vmem_limit),
        cost_estimate=cost,
    )(ids3, emb_p, pe_p)

    if (sp, dp) != (S, D):
        out_p = out_p[:, :S, :D]
    return out_p


def make_pe(sens_len, embeds_dim, dtype=jnp.float32):
    """Matches the PyTorch loop:
       pe[i, j] = sin(i / 10000**(j/d)) if j % 2 == 0 else cos(i / 10000**(j/d))"""
    pos = jnp.arange(sens_len, dtype=jnp.float32)[:, None]        # (S, 1)
    j = jnp.arange(embeds_dim, dtype=jnp.float32)[None, :]        # (1, D)
    angle = pos / jnp.power(10000.0, j / float(embeds_dim))       # (S, D)
    even = (jnp.arange(embeds_dim) % 2 == 0)[None, :]
    pe = jnp.where(even, jnp.sin(angle), jnp.cos(angle))
    return pe.astype(dtype)


if __name__ == "__main__":
    # Small shapes consistent with the module's forward.
    words_size = 32     # vocabulary size
    sens_len = 8        # sequence length
    embeds_dim = 32     # embedding dimension
    batch = 2

    key = jax.random.PRNGKey(0)
    k_emb, k_ids = jax.random.split(key)

    # nn.Embedding default init: N(0, 1). Deterministic, synthetic.
    emb_table = jax.random.normal(k_emb, (words_size, embeds_dim), dtype=jnp.float32)
    pe = make_pe(sens_len, embeds_dim)
    ids = jax.random.randint(k_ids, (batch, sens_len), 0, words_size, dtype=jnp.int32)

    out = position_embedding(ids, emb_table, pe)
    out = jax.block_until_ready(out)

    # Reference check (plain JAX) for the forward semantics.
    ref = emb_table[ids] + pe[None, :, :]
    assert out.shape == (batch, sens_len, embeds_dim)
    assert jnp.allclose(out, ref, atol=1e-5, rtol=1e-5), "mismatch vs reference"

    print("KERNEL_OK")
</pallas_src>

<mosaic_0001>
module attributes {stable_mosaic.version = 11 : i64} {
  func.func @_pos_embed_kernel(%arg0: i32, %arg1: i32, %arg2: i32, %arg3: memref<1x8x1xi32, #tpu.memory_space<vmem>>, %arg4: memref<32x128xf32, #tpu.memory_space<vmem>>, %arg5: memref<8x128xf32, #tpu.memory_space<vmem>>, %arg6: memref<1x8x128xf32, #tpu.memory_space<vmem>>, %arg7: memref<8x128xf32, #tpu.memory_space<vmem>>) attributes {dimension_semantics = [#tpu.dimension_semantics<parallel>, #tpu.dimension_semantics<parallel>, #tpu.dimension_semantics<arbitrary>], iteration_bounds = array<i64: 1, 2, 1>, scalar_prefetch = 0 : i64, scratch_operands = 1 : i64, tpu.core_type = #tpu.core_type<tc>, window_params = [{transform_indices = @transform_0, window_bounds = array<i64: 1, 8, 1>}, {transform_indices = @transform_1, window_bounds = array<i64: 32, 128>}, {transform_indices = @transform_2, window_bounds = array<i64: 8, 128>}, {transform_indices = @transform_3, window_bounds = array<i64: 1, 8, 128>}]} {
    %c0_i32 = arith.constant 0 : i32
    %0 = arith.cmpi eq, %arg2, %c0_i32 : i32
    %1 = arith.extui %0 : i1 to i32
    %c0_i32_0 = arith.constant 0 : i32
    %2 = arith.cmpi ne, %1, %c0_i32_0 : i32
    scf.if %2 {
      %cst_11 = arith.constant 0.000000e+00 : f32
      %21 = vector.broadcast %cst_11 : f32 to vector<8x128xf32>
      %c0_12 = arith.constant 0 : index
      %c0_13 = arith.constant 0 : index
      %22 = vector.load %arg7[%c0_12, %c0_13] : memref<8x128xf32, #tpu.memory_space<vmem>>, vector<8x128xf32>
      tpu.vector_store %arg7[%c0_12, %c0_13], %21 {strides = array<i32>} : memref<8x128xf32, #tpu.memory_space<vmem>>, vector<8x128xf32>,
    } else {
    }
    %c0 = arith.constant 0 : index
    %c0_1 = arith.constant 0 : index
    %c0_2 = arith.constant 0 : index
    %3 = vector.load %arg3[%c0, %c0_1, %c0_2] : memref<1x8x1xi32, #tpu.memory_space<vmem>>, vector<1x8x1xi32>
    %4 = vector.shape_cast %3 : vector<1x8x1xi32> to vector<8x1xi32>
    %5 = tpu.iota {dimensions = array<i32: 1>} : vector<8x32xi32>
    %c32_i32 = arith.constant 32 : i32
    %6 = arith.muli %arg2, %c32_i32 : i32
    %7 = vector.broadcast %6 : i32 to vector<8x32xi32>
    %8 = arith.addi %5, %7 : vector<8x32xi32>
    %9 = vector.broadcast %4 : vector<8x1xi32> to vector<8x32xi32>
    %10 = arith.cmpi eq, %9, %8 : vector<8x32xi32>
    %11 = arith.extui %10 : vector<8x32xi1> to vector<8x32xi32>
    %12 = arith.sitofp %11 : vector<8x32xi32> to vector<8x32xf32>
    %c0_3 = arith.constant 0 : index
    %c0_4 = arith.constant 0 : index
    %13 = vector.load %arg7[%c0_3, %c0_4] : memref<8x128xf32, #tpu.memory_space<vmem>>, vector<8x128xf32>
    %c0_5 = arith.constant 0 : index
    %c0_6 = arith.constant 0 : index
    %14 = vector.load %arg4[%c0_5, %c0_6] : memref<32x128xf32, #tpu.memory_space<vmem>>, vector<32x128xf32>
    %cst = arith.constant dense<0.000000e+00> : vector<8x128xf32>
    %15 = tpu.matmul %12, %14, %cst {dimension_numbers = #tpu.dot_dimension_numbers<[1], [0], [0], [1], [0, 0, 1, 1], [], []>} : vector<8x32xf32>, vector<32x128xf32>, vector<8x128xf32> -> vector<8x128xf32>
    %16 = arith.addf %13, %15 : vector<8x128xf32>
    %c0_7 = arith.constant 0 : index
    %c0_8 = arith.constant 0 : index
    %17 = vector.load %arg7[%c0_7, %c0_8] : memref<8x128xf32, #tpu.memory_space<vmem>>, vector<8x128xf32>
    tpu.vector_store %arg7[%c0_7, %c0_8], %16 {strides = array<i32>} : memref<8x128xf32, #tpu.memory_space<vmem>>, vector<8x128xf32>,
    %c0_i32_9 = arith.constant 0 : i32
    %18 = arith.cmpi eq, %arg2, %c0_i32_9 : i32
    %19 = arith.extui %18 : i1 to i32
    %c0_i32_10 = arith.constant 0 : i32
    %20 = arith.cmpi ne, %19, %c0_i32_10 : i32
    scf.if %20 {
      %c0_11 = arith.constant 0 : index
      %c0_12 = arith.constant 0 : index
      %21 = vector.load %arg7[%c0_11, %c0_12] : memref<8x128xf32, #tpu.memory_space<vmem>>, vector<8x128xf32>
      %c0_13 = arith.constant 0 : index
      %c0_14 = arith.constant 0 : index
      %22 = vector.load %arg5[%c0_13, %c0_14] : memref<8x128xf32, #tpu.memory_space<vmem>>, vector<8x128xf32>
      %23 = arith.addf %21, %22 : vector<8x128xf32>
      %c0_15 = arith.constant 0 : index
      %c0_16 = arith.constant 0 : index
      %c0_17 = arith.constant 0 : index
      %24 = vector.load %arg6[%c0_15, %c0_16, %c0_17] : memref<1x8x128xf32, #tpu.memory_space<vmem>>, vector<1x8x128xf32>
      %25 = vector.shape_cast %24 : vector<1x8x128xf32> to vector<8x128xf32>
      %26 = vector.shape_cast %23 : vector<8x128xf32> to vector<1x8x128xf32>
      tpu.vector_store %arg6[%c0_15, %c0_16, %c0_17], %26 {strides = array<i32>} : memref<1x8x128xf32, #tpu.memory_space<vmem>>, vector<1x8x128xf32>,
    } else {
    }
    return
  }
  func.func @transform_0(%arg0: i32, %arg1: i32, %arg2: i32) -> (i32, i32, i32) {
    %c0_i32 = arith.constant 0 : i32
    %c0_i32_0 = arith.constant 0 : i32
    return %arg1, %arg0, %c0_i32 : i32, i32, i32
  }
  func.func @transform_1(%arg0: i32, %arg1: i32, %arg2: i32) -> (i32, i32) {
    %c0_i32 = arith.constant 0 : i32
    %c0_i32_0 = arith.constant 0 : i32
    return %arg2, %c0_i32 : i32, i32
  }
  func.func @transform_2(%arg0: i32, %arg1: i32, %arg2: i32) -> (i32, i32) {
    %c0_i32 = arith.constant 0 : i32
    %c0_i32_0 = arith.constant 0 : i32
    return %arg0, %c0_i32 : i32, i32
  }
  func.func @transform_3(%arg0: i32, %arg1: i32, %arg2: i32) -> (i32, i32, i32) {
    %c0_i32 = arith.constant 0 : i32
    %c0_i32_0 = arith.constant 0 : i32
    return %arg1, %arg0, %c0_i32 : i32, i32, i32
  }
}

</mosaic_0001>

<bundles_post_ra>
// kernel: tpu_custom_call.1
= control target key start
LH: loop header
LB: loop body
LE: loop exit
PB: predicated region body
PF: predicated region fallthrough
CT: control target
= control target key end

     0   :  { %8 = vsyncpa [#allocation4], 0  ;;  %s866_s0 = inlined_call_operand.vmem [shape: s32[2,8,1], index: 0, kind: input, shape index: {}]   ;;  %s867_s1 = inlined_call_operand.hbm [shape: f32[32,128], index: 1, kind: input, shape index: {}]   ;;  %s868_s2 = inlined_call_operand.vmem [shape: f32[8,128], index: 2, kind: input, shape index: {}]   ;;  %s869_s3 = inlined_call_operand.hbm [shape: f32[2,8,128], index: 3, kind: output, shape index: {}]  }
   0x1   :  { %9 = vsyncpa [#allocation5], 0 }
   0x2   :  { %11 = vsyncpa [#allocation5 + $0x1], 0  ;;  %s713_s12 = smov 0   ;;  %s715_s13 = smov 0  }
   0x3   :  { %s717_s14 = smov 0   ;;  %s719_s15 = smov 0  }
   0x4   :  { %s721_s16 = smov 0   ;;  %s723_s17 = smov 0  }
   0x5 LB: > { %s462_s18 = sadd.s32 4294967295, %s683_s17   ;;  %s463_s19 = sadd.s32 4294967294, %s683_s17   ;;  %s683_s17 = sphi %s723_s17, %s17_s17   ;;  %s679_s16 = sphi %s721_s16, %s887_s16   ;;  %s675_s15 = sphi %s719_s15, %s886_s15   ;;  %s671_s14 = sphi %s717_s14, %s885_s14   ;;  %s667_s13 = sphi %s715_s13, %s884_s13   ;;  %s663_s12 = sphi %s713_s12, %s883_s12  }
   0x6   : > { %s32_s20 = sadd.s32 1, %s679_s16  ;;  %s125_s21 = sadd.s32 1, %s671_s14 }
   0x7   : > { %p34_p0 = scmp.ge.s32.totalorder %s32_s20, 2  ;;  %p135_p1 = scmp.ne.s32.totalorder %s671_s14, %s667_s13 }
   0x8   : > { %p136_p2 = scmp.eq.s32.totalorder %s462_s18, 1  ;;  %p141_p3 = scmp.ne.s32.totalorder %s667_s13, %s663_s12 }
   0x9   : > { %s889_s20 = smov (%p34_p0, %s32_s20), 0  ;;  %p142_p5 = scmp.eq.s32.totalorder %s463_s19, 1 }
   0xa   : > { %p753_p4 = por %p136_p2, %p135_p1  ;;  %s120_s23 = ssub.s32 %s679_s16, %s889_s20 }
   0xb   : > { %p464_p6 = scmp.ge.s32.totalorder %s683_s17, 1  ;;  %p123_p7 = scmp.eq.s32.totalorder %s120_s23, 0 }
   0xc   : > { %s874_s22 = scalar_select %p753_p4, 1, 0 }
   0xd   : > { %p760_p8 = por %p142_p5, %p141_p3  ;;  %p149_p9 = scmp.lt.s32.totalorder %s683_s17, 3 }
   0xe   : > { %s766_s25 = scalar_select %p123_p7, %s671_s14, %s125_s21  }
   0xf   : > { %s875_s24 = scalar_select %p760_p8, 1, 0 }
  0x10   : > { %p768_p10 = pnand %p464_p6, %p149_p9  ;;  %p772_p11 = scmp.eq.s32.totalorder %s462_s18, 0 }
  0x11   : > { %s685_s28 = smov [#allocation3]   ;;  %s573_s6 = scalar_lea.hbm %s867_s1, 512 }
  0x12   : > { %s876_s26 = scalar_select %p768_p10, 1, 0 }
  0x13   : > { %s877_s27 = scalar_select %p772_p11, 1, 0 }
  0x14   : > { %p506_p12 = pneg %p768_p10  ;;  %s164_s29 = sshll.u32 %s685_s28, 4  ;;  %s165_s29 = int_to_ptr.vmem [resolvable:$true] %s164_s29 }
  0x15   : > { %p574_p0 = scmp.ne.s32.totalorder %s867_s1, %s573_s6  ;;  %p580_p5 = scmp.lt.u32.totalorder %s573_s6, %s867_s1 }
  0x16   : > { %p780_p13 = pnand %p772_p11, %p506_p12 }
  0x18   : > { %p575_p1 = pneg %p780_p13 }
  0x1a   : > { %p576_p2 = pnand %p575_p1, %p574_p0 }
  0x1c   : > { %p577_p3 = pneg %p576_p2 }
  0x1e   : > { %p582_p6 = pnand %p580_p5, %p577_p3 }
  0x20   : > { %585 = shalt.err (!%p582_p6)
}
  0x21   : > { %s586_s11 = scalar_lea.vmem %s165_s29, 512  ;;  %p594_p8 = scmp.lt.s32.totalorder %s165_s29, %s165_s29 }
  0x22   : > { %p587_p7 = scmp.ne.s32.totalorder %s165_s29, %s586_s11  ;;  %p595_p4 = scmp.lt.s32.totalorder %s586_s11, %s586_s11 }
  0x24   : > { %p589_p9 = pnand %p587_p7, %p575_p1  ;;  %p596_p11 = por %p595_p4, %p594_p8 }
  0x26   : > { %p590_p12 = pneg %p589_p9 }
  0x28   : > { %p597_p10 = pnand %p596_p11, %p590_p12 }
  0x2a   : > { %600 = shalt.err (!%p597_p10)
}
  0x2b   : > { %s686_s18 = smov 128   ;;  %s687_s19 = smov 8  }
  0x2c   : > { %509 = dma.hbm_to_vmem [thread:$0]  (!%p780_p13), %s867_s1, 512, %s165_s29, [#allocation4], %s686_s18, %s686_s18, %s687_s19  }
  0x2d   : > { %p879_p0 = scmp.ne.s32.totalorder %s876_s26, 0 }
  0x2e   : > { %p880_p2 = scmp.ne.s32.totalorder (!%p879_p0), %s877_s27, 0 }
  0x2f   : > { %197 = sbr.rel (%p879_p0) target bundleno = 420 (0x1a4), region = 32 }
  0x36   : > { %654 = dma.done.wait (%p880_p2), [#allocation4], 512  }
  0x37   : > { %656 = vsyncadd (%p880_p2), [#allocation4], 4294966784  ;;  %p227_p4 = scmp.lt.s32.totalorder %s675_s15, 1  ;;  %v688_v0 = vmov 0   ;;  %v689_v1 = vmov 0.0|0.0   ;;  %v257_v3 = vld [vmem:[#allocation3] sm:$0xff]  ;;  %v245_v10 = vlaneseq }
  0x38   : > { %572 = vset.pattern.permute.xlu0 %v688_v0  ;;  %494 = vmatprep.subr.bf16.mxu0 %v689_v1  ;;  %v258_v4 = vld [vmem:[#allocation3 + $0x8] sm:$0xff]  ;;  %v259_v6 = vld [vmem:[#allocation3 + $0x10] sm:$0xff]  ;;  %v260_v7 = vld [vmem:[#allocation3 + $0x18] sm:$0xff]  ;;  %vm690_vm0 = vmmov 0   ;;  %v691_v8 = vmov 0.0   ;;  %vm261_vm1 = vcmask 261120  }
  0x39   : > { %s228_s28 = scalar_select %p227_p4, %s675_s15, 1  ;;  %v495_v5 = vpack.c.bf16 %v258_v4, %v257_v3  ;;  %491 = vmatprep.mubr.msk.f32.mxu0 %vm690_vm0, %v691_v8  ;;  %v498_v9 = vpack.c.bf16 %v260_v7, %v259_v6  ;;  %v246_v11 = vand.u32 127, %v245_v10  ;;  %v341_v14 = vld [vmem:[%s868_s2] sm:$0xff] }
  0x3a   : > { %s224_s27 = sand.u32 1, %s667_s13   ;;  %s475_s8 = sshll.u32 %s675_s15, 7 }
  0x3b   : > { %s471_s30 = sshll.u32 %s228_s28, 3  ;;  %496 = vmatpush3.bf16.msra.mxu0 %v495_v5  ;;  %s470_s5 = sshll.u32 %s224_s27, 3 }
  0x3c   : > { %s233_s26 = scalar_lea.vmem %s866_s0, %s471_s30  ;;  %497 = vmatprep.subr.bf16.mxu0 %v689_v1  ;;  %s226_s9 = scalar_lea.vmem [#allocation6], %s470_s5 }
  0x3d   : > { %v244_v2 = vld [vmem:[%s233_s26] sm:$0xff]  ;;  %s359_s10 = sshll.u32 %s226_s9, 4  ;;  %s819_s19 = scalar_lea.hbm %s869_s3, %s475_s8  ;;  %s821_s10 = int_to_ptr.vmem [resolvable:$true] %s359_s10 }
  0x3e   : > { %251 = vperm.xlu0 %572, %v244_v2   ;;  %s345_s21 = scalar_lea.sflag [#allocation5], %s224_s27  ;;  %s601_s23 = scalar_lea.vmem %s821_s10, 128 }
  0x3f   : > { %499 = vmatpush3.bf16.msra.mxu0 %v498_v9  ;;  %p602_p8 = scmp.ne.s32.totalorder %s821_s10, %s601_s23  ;;  %p881_p10 = scmp.ne.s32.totalorder %s874_s22, 0 }
  0x40   : > { %s692_s15 = smov [#allocation6]  }
  0x41   : > { %p603_p11 = pnand %p602_p8, %p881_p10  ;;  %s605_s28 = sshll.u32 %s692_s15, 4  ;;  %s606_s28 = int_to_ptr.vmem [resolvable:$false] %s605_s28 }
  0x42   : > { %s607_s30 = scalar_lea.vmem %s606_s28, 256  ;;  %p608_p1 = scmp.lt.s32.totalorder %s821_s10, %s606_s28 }
  0x43   : > { %p604_p13 = pneg %p603_p11  ;;  %p609_p3 = scmp.lt.s32.totalorder %s607_s30, %s601_s23 }
  0x45   : > { %p610_p5 = por %p609_p3, %p608_p1 }
  0x47   : > { %p611_p6 = pnand %p610_p5, %p604_p13 }
  0xbd   : > { %v252_v12 = vpop.permute.xlu0 %251 }
  0xbe   : > { %vm253_vm2 = vcmp.eq.s32.totalorder %v252_v12, %v246_v11 }
  0xbf   : > { %v472_v13 = vsel %vm253_vm2, 1.0, %v691_v8 }
  0xc0   : > { %492 = vmatmul.mubr.msk.f32.vlgmr.msra.gmra.mrb[0].mxu0 %vm261_vm1, %v472_v13 }
 0x193   : > { %v331_v15 = vpop.f32.mrb[0].mxu0 }
 0x194   : > { %v342_v16 = vadd.f32 %v341_v14, %v331_v15  ;;  %v493_v17 = vpop.f32.mrb[1].mxu0 }
 0x196   : > { %343 = vst [vmem:[%s226_s9] sm:$0xff] %v342_v16 }
 0x197   : > { %614 = shalt.err (!%p611_p6)
}
 0x198   : > { %s615_s4 = scalar_lea.hbm %s819_s19, 128  ;;  %s619_s27 = scalar_lea.hbm %s869_s3, 256 }
 0x199   : > { %p616_p7 = scmp.ne.s32.totalorder %s819_s19, %s615_s4  ;;  %p620_p0 = scmp.lt.u32.totalorder %s819_s19, %s869_s3 }
 0x19a   : > { %p621_p2 = scmp.lt.u32.totalorder %s619_s27, %s615_s4  ;;  %p623_p8 = scmp.lt.u32.totalorder %s615_s4, %s819_s19 }
 0x19b   : > { %p617_p9 = pnand %p616_p7, %p881_p10 }
 0x19c   : > { %p622_p4 = por %p621_p2, %p620_p0 }
 0x19d   : > { %p618_p12 = pneg %p617_p9 }
 0x19e   : > { %p624_p11 = por %p623_p8, %p622_p4 }
 0x1a0   : > { %p625_p13 = pnand %p624_p11, %p618_p12 }
 0x1a2   : > { %628 = shalt.err (!%p625_p13)
}
 0x1a3   : > { %504 = dma.vmem_to_hbm [thread:$0]  (%p881_p10), %s821_s10, 128, %s819_s19, %s345_s21  }
 0x1a4 PF: > { %p516_p1 = scmp.ge.s32.totalorder %s683_s17, 2  ;;  %s371_s7 = sand.u32 1, %s663_s12  }
 0x1a5   : > { %p882_p3 = scmp.ne.s32.totalorder %s875_s24, 0  ;;  %s372_s8 = scalar_lea.sflag [#allocation5], %s371_s7 }
 0x1a7   : > { %p511_p5 = pnand %p516_p1, %p882_p3 }
 0x1a9   : > { %658 = dma.done.wait (!%p511_p5), %s372_s8, 128  }
 0x1aa   : > { %660 = vsyncadd (!%p511_p5), %s372_s8, 4294967168  ;;  %s17_s17 = sadd.s32 1, %s683_s17   ;;  %s883_s12 = smov %s667_s13 }
 0x1ab   : > { %p14_p6 = scmp.ge.s32.totalorder %s17_s17, 4   ;;  %s884_s13 = smov %s671_s14 }
 0x1ac   : > { %s885_s14 = smov %s766_s25  ;;  %s886_s15 = smov %s679_s16 }
 0x1ad   : > { %s887_s16 = smov %s889_s20  ;;  %16 = sbr.rel (!%p14_p6) target bundleno = 5 (0x5), region = 84 }
 0x1b4   :  { %377 = vsyncpa [#allocation4], 1 }
 0x1b5   :  { %379 = vsyncpa [#allocation4 + $0x1], 1 }
 0x1b6   :  { %380 = vsyncpa [#allocation5], 1 }
 0x1b7   :  { %382 = vsyncpa [#allocation5 + $0x1], 1 }

</bundles_post_ra>
